<compile_context>
chip_gen: v7x
topology: tpu7x:2x2x1
jax: 0.10.0
libtpu: 0.0.40
codegen_flags: <defaults>
</compile_context>

<pallas_src>
import functools
import math

import jax
import jax.numpy as jnp
from jax.experimental import pallas as pl
from jax.experimental.pallas import tpu as pltpu

EPS = 1e-5                      # ScaleNorm eps (matches the PyTorch module)
NEG_INF = -1e30                 # finite mask value; exp underflows to exactly 0
VMEM_LIMIT = 48 * 1024 * 1024   # explicit budget: > 32 MiB default, < v7x 64 MiB physical


# --------------------------------------------------------------------------- #
# Kernel 1: ScaleNorm (norm1) + fused QKV projection
# --------------------------------------------------------------------------- #
def _norm_qkv_kernel(x_ref, g_ref, wq_ref, wkv_ref, bq_ref, bkv_ref,
                     q_ref, kv_ref):
    x = x_ref[...]                                               # (TS, D) f32
    ssq = jnp.sum(x * x, axis=-1, keepdims=True)                 # f32
    inv = jax.lax.rsqrt(jnp.maximum(ssq, EPS * EPS))             # EUP rsqrt, no divide
    h = ((g_ref[0] * inv) * x).astype(jnp.bfloat16)              # ScaleNorm -> bf16 MXU operand
    q_ref[...] = (jnp.dot(h, wq_ref[...], preferred_element_type=jnp.float32)
                  + bq_ref[...]).astype(q_ref.dtype)             # 1/sqrt(Dh) already folded in
    kv_ref[...] = (jnp.dot(h, wkv_ref[...], preferred_element_type=jnp.float32)
                   + bkv_ref[...]).astype(kv_ref.dtype)


# --------------------------------------------------------------------------- #
# Kernel 2: causal multi-query attention (heads batched, flash-style kv tiling)
# --------------------------------------------------------------------------- #
def _mqa_attention_kernel(q_ref, kv_ref, o_ref, m_sc, l_sc, acc_sc, *, dh, tq, tk):
    qi = pl.program_id(1)
    kv = pl.program_id(2)

    @pl.when(kv == 0)
    def _():
        m_sc[...] = jnp.full_like(m_sc, -jnp.inf)
        l_sc[...] = jnp.zeros_like(l_sc)
        acc_sc[...] = jnp.zeros_like(acc_sc)

    @pl.when(kv <= qi)   # kv blocks strictly above the causal diagonal contribute nothing
    def _():
        q = q_ref[...].astype(jnp.bfloat16)                      # (H, TQ, Dh)
        kvb = kv_ref[...]                                        # (TK, 2*Dh)
        k = kvb[:, :dh].astype(jnp.bfloat16)
        v = kvb[:, dh:].astype(jnp.bfloat16)
        s = jnp.einsum("htd,sd->hts", q, k,
                       preferred_element_type=jnp.float32)       # (H, TQ, TK) f32
        row = qi * tq + jax.lax.broadcasted_iota(jnp.int32, s.shape, 1)
        col = kv * tk + jax.lax.broadcasted_iota(jnp.int32, s.shape, 2)
        s = jnp.where(col > row, NEG_INF, s)                     # causal mask
        m_prev = m_sc[...]
        m_new = jnp.maximum(m_prev, jnp.max(s, axis=-1, keepdims=True))
        alpha = jnp.exp(m_prev - m_new)
        p = jnp.exp(s - m_new)
        l_sc[...] = alpha * l_sc[...] + jnp.sum(p, axis=-1, keepdims=True)
        acc_sc[...] = alpha * acc_sc[...] + jnp.einsum(
            "hts,sd->htd", p.astype(jnp.bfloat16), v,
            preferred_element_type=jnp.float32)
        m_sc[...] = m_new

    @pl.when(kv == qi)   # last contributing kv block for this q tile -> finalize
    def _():
        o_ref[...] = (acc_sc[...] * pl.reciprocal(l_sc[...], approx=True)
                      ).astype(o_ref.dtype)


# --------------------------------------------------------------------------- #
# Kernel 3: out_proj + residual + ScaleNorm (norm2) + FFN (GELU tanh) + residual
# --------------------------------------------------------------------------- #
def _outproj_ffn_kernel(x_ref, a_ref, g_ref, wo_ref, bo_ref, w1_ref, b1_ref,
                        w2_ref, b2_ref, o_ref):
    x = x_ref[...]                                               # (TS, D) f32 residual
    a = a_ref[...].astype(jnp.bfloat16)                          # attention output
    x1 = x + jnp.dot(a, wo_ref[...], preferred_element_type=jnp.float32) + bo_ref[...]
    ssq = jnp.sum(x1 * x1, axis=-1, keepdims=True)
    inv = jax.lax.rsqrt(jnp.maximum(ssq, EPS * EPS))             # EUP rsqrt, no divide
    h = ((g_ref[0] * inv) * x1).astype(jnp.bfloat16)             # ScaleNorm -> bf16
    u = jnp.dot(h, w1_ref[...], preferred_element_type=jnp.float32) + b1_ref[...]
    c = math.sqrt(2.0 / math.pi)
    act = 0.5 * u * (1.0 + jnp.tanh(c * (u + 0.044715 * u * u * u)))   # GELU(tanh), f32
    f = jnp.dot(act.astype(jnp.bfloat16), w2_ref[...],
                preferred_element_type=jnp.float32) + b2_ref[...]
    o_ref[...] = (x1 + f).astype(o_ref.dtype)
    # TODO(synk): training-mode dropout (rate > 0) would use pltpu.prng_*; eval
    # path (dropout == 0) is the identity, matching the module in eval mode.
    # TODO(synk): for very large D/Fd that exceed v7x's 64 MiB VMEM even in bf16,
    # add an Fd-reduction grid axis (tile w1 cols / w2 rows, f32 VMEM accumulator,
    # "arbitrary" axis with pl.when init/finalize).


# --------------------------------------------------------------------------- #
# Wrapper
# --------------------------------------------------------------------------- #
def _pick_tile(s, pref):
    """Largest seq tile <= pref that divides S (multiple of 16 for bf16 packing)."""
    t = min(pref, s)
    if s % t == 0 and (t % 16 == 0 or t == s):
        return t
    for cand in (512, 256, 128, 64, 32, 16):
        if cand <= pref and s % cand == 0:
            return cand
    return s


def prepare_params(params, *, dim_head):
    """One-time parameter prep: bf16 weights for the MXU, fused K/V projection,
    1/sqrt(Dh) folded into the Q projection, lane-dense 2-D f32 bias views."""
    D = params["wq"].shape[0]
    Dh = dim_head
    Fd = params["w1"].shape[1]
    scale = 1.0 / math.sqrt(Dh)
    wkv = jnp.concatenate([params["wk"], params["wv"]], axis=1)          # (D, 2*Dh)
    bkv = jnp.concatenate([params["bk"], params["bv"]], axis=0)          # (2*Dh,)
    f32 = jnp.float32
    bf16 = jnp.bfloat16
    return dict(
        g1=params["g1"].astype(f32),
        g2=params["g2"].astype(f32),
        wq=(params["wq"] * scale).astype(bf16),
        bq=(params["bq"] * scale).reshape(1, D).astype(f32),
        wkv=wkv.astype(bf16),
        bkv=bkv.reshape(1, 2 * Dh).astype(f32),
        wo=params["wo"].astype(bf16),
        bo=params["bo"].reshape(1, D).astype(f32),
        w1=params["w1"].astype(bf16),
        b1=params["b1"].reshape(1, Fd).astype(f32),
        w2=params["w2"].astype(bf16),
        b2=params["b2"].reshape(1, D).astype(f32),
    )


def midinet_layer(x, p, *, num_heads, dim_head, seq_tile=256, attn_tile=128):
    """x: (B, S, D) with D = num_heads * dim_head. Causal path (padding_mask=None).
    `p` must come from prepare_params()."""
    B, S, D = x.shape
    H, Dh = num_heads, dim_head
    assert D == H * Dh
    Fd = p["w1"].shape[1]
    dtype = x.dtype
    act_dtype = jnp.bfloat16        # q / kv / attn intermediates (halves HBM traffic)

    TS = _pick_tile(S, seq_tile)    # projection / FFN seq tile
    TQ = _pick_tile(S, attn_tile)   # attention q / kv tile
    assert S % TS == 0 and S % TQ == 0
    nkv = S // TQ

    smem_spec = pl.BlockSpec(memory_space=pltpu.MemorySpace.SMEM)

    def resident(shape):
        # Grid-invariant weight/bias block: DMA'd once, single-buffered (double
        # buffering a block whose index never changes is pure VMEM waste).
        return pl.BlockSpec(shape, lambda b, s: (0,) * len(shape),
                            pipeline_mode=pl.Buffered(1))

    cp2 = pltpu.CompilerParams(dimension_semantics=("parallel", "parallel"),
                               vmem_limit_bytes=VMEM_LIMIT)
    cp3 = pltpu.CompilerParams(
        dimension_semantics=("parallel", "parallel", "arbitrary"),
        vmem_limit_bytes=VMEM_LIMIT)

    # ---- kernel 1: norm1 + fused QKV -------------------------------------- #
    q, kvp = pl.pallas_call(
        _norm_qkv_kernel,
        out_shape=(jax.ShapeDtypeStruct((B, S, D), act_dtype),
                   jax.ShapeDtypeStruct((B, S, 2 * Dh), act_dtype)),
        grid=(B, S // TS),
        in_specs=[pl.BlockSpec((None, TS, D), lambda b, s: (b, s, 0)),
                  smem_spec,
                  resident((D, D)), resident((D, 2 * Dh)),
                  resident((1, D)), resident((1, 2 * Dh))],
        out_specs=(pl.BlockSpec((None, TS, D), lambda b, s: (b, s, 0)),
                   pl.BlockSpec((None, TS, 2 * Dh), lambda b, s: (b, s, 0))),
        compiler_params=cp2,
    )(x, p["g1"], p["wq"], p["wkv"], p["bq"], p["bkv"])

    # ---- kernel 2: causal MQA attention ------------------------------------ #
    # Head split is wrapper-side layout plumbing.
    # TODO(synk): when Dh % 128 == 0 both transposes can be removed by indexing
    # heads on the lane axis of the (B, S, D) tensor directly in the BlockSpec.
    qh = q.reshape(B, S, H, Dh).transpose(0, 2, 1, 3)            # (B, H, S, Dh)

    attn_kernel = functools.partial(_mqa_attention_kernel, dh=Dh, tq=TQ, tk=TQ)
    oh = pl.pallas_call(
        attn_kernel,
        out_shape=jax.ShapeDtypeStruct((B, H, S, Dh), act_dtype),
        grid=(B, S // TQ, nkv),
        in_specs=[pl.BlockSpec((None, H, TQ, Dh), lambda b, qi, kv: (b, 0, qi, 0)),
                  # clamp kv index so skipped (above-diagonal) steps re-use the
                  # already-resident kv block instead of issuing a wasted DMA
                  pl.BlockSpec((None, TQ, 2 * Dh),
                               lambda b, qi, kv: (b, jnp.minimum(kv, qi), 0))],
        out_specs=pl.BlockSpec((None, H, TQ, Dh), lambda b, qi, kv: (b, 0, qi, 0)),
        scratch_shapes=[pltpu.VMEM((H, TQ, 1), jnp.float32),     # m (running max)
                        pltpu.VMEM((H, TQ, 1), jnp.float32),     # l (running sum)
                        pltpu.VMEM((H, TQ, Dh), jnp.float32)],   # acc
        compiler_params=cp3,
    )(qh, kvp)
    attn = oh.transpose(0, 2, 1, 3).reshape(B, S, D)             # back to (B, S, D)

    # ---- kernel 3: out_proj + residual + norm2 + FFN + residual ------------ #
    out = pl.pallas_call(
        _outproj_ffn_kernel,
        out_shape=jax.ShapeDtypeStruct((B, S, D), dtype),
        grid=(B, S // TS),
        in_specs=[pl.BlockSpec((None, TS, D), lambda b, s: (b, s, 0)),
                  pl.BlockSpec((None, TS, D), lambda b, s: (b, s, 0)),
                  smem_spec,
                  resident((D, D)), resident((1, D)),
                  resident((D, Fd)), resident((1, Fd)),
                  resident((Fd, D)), resident((1, D))],
        out_specs=pl.BlockSpec((None, TS, D), lambda b, s: (b, s, 0)),
        compiler_params=cp2,
    )(x, attn, p["g2"], p["wo"], p["bo"], p["w1"], p["b1"], p["w2"], p["b2"])
    return out


# --------------------------------------------------------------------------- #
# Parameter construction + pure-JAX reference (f32, raw params)
# --------------------------------------------------------------------------- #
def init_params(key, num_heads, dim_head, dim_feedforward, dtype=jnp.float32):
    D, Dh, Fd = num_heads * dim_head, dim_head, dim_feedforward
    ks = jax.random.split(key, 10)

    def xavier(k, fin, fout):
        lim = math.sqrt(6.0 / (fin + fout))
        return jax.random.uniform(k, (fin, fout), dtype, -lim, lim)

    wqkv = xavier(ks[0], D, D + 2 * Dh)
    return dict(
        g1=jnp.full((1,), math.sqrt(D), dtype) * 1.05,
        g2=jnp.full((1,), math.sqrt(D), dtype) * 0.95,
        wq=wqkv[:, :D], wk=wqkv[:, D:D + Dh], wv=wqkv[:, D + Dh:],
        bq=0.1 * jax.random.normal(ks[1], (D,), dtype),
        bk=0.1 * jax.random.normal(ks[2], (Dh,), dtype),
        bv=0.1 * jax.random.normal(ks[3], (Dh,), dtype),
        wo=xavier(ks[4], D, D), bo=0.1 * jax.random.normal(ks[5], (D,), dtype),
        w1=xavier(ks[6], D, Fd), b1=0.1 * jax.random.normal(ks[7], (Fd,), dtype),
        w2=xavier(ks[8], Fd, D), b2=0.1 * jax.random.normal(ks[9], (D,), dtype),
    )


def _reference(x, params, *, num_heads, dim_head):
    B, S, D = x.shape
    H, Dh = num_heads, dim_head

    def scale_norm(t, g):
        n = jnp.maximum(jnp.linalg.norm(t, axis=-1, keepdims=True), EPS)
        return g * t / n

    h = scale_norm(x, params["g1"])
    q = h @ params["wq"] + params["bq"]
    k = h @ params["wk"] + params["bk"]
    v = h @ params["wv"] + params["bv"]
    q = q.reshape(B, S, H, Dh).transpose(0, 2, 1, 3)
    s = jnp.einsum("bhqd,bkd->bhqk", q, k) / math.sqrt(Dh)
    causal = jnp.tril(jnp.ones((S, S), dtype=bool))
    s = jnp.where(causal[None, None], s, -jnp.inf)
    p = jax.nn.softmax(s, axis=-1)
    o = jnp.einsum("bhqk,bkd->bhqd", p, v)
    attn = o.transpose(0, 2, 1, 3).reshape(B, S, D)
    x1 = x + attn @ params["wo"] + params["bo"]
    h2 = scale_norm(x1, params["g2"])
    u = h2 @ params["w1"] + params["b1"]
    act = 0.5 * u * (1.0 + jnp.tanh(math.sqrt(2.0 / math.pi) * (u + 0.044715 * u ** 3)))
    return x1 + act @ params["w2"] + params["b2"]


if __name__ == "__main__":
    key = jax.random.PRNGKey(0)
    num_heads, dim_head, dim_ff = 4, 8, 64
    B, S = 2, 8
    D = num_heads * dim_head

    kx, kp = jax.random.split(key)
    x = jax.random.normal(kx, (B, S, D), dtype=jnp.float32)
    params = init_params(kp, num_heads, dim_head, dim_ff)
    prepped = prepare_params(params, dim_head=dim_head)

    out = midinet_layer(x, prepped, num_heads=num_heads, dim_head=dim_head)
    jax.block_until_ready(out)

    ref = _reference(x, params, num_heads=num_heads, dim_head=dim_head)
    assert out.shape == x.shape and out.dtype == x.dtype
    max_err = float(jnp.max(jnp.abs(out - ref)))
    # bf16 matmul operands + f32 accumulation/softmax/norm -> loose-ish tolerance
    assert jnp.allclose(out, ref, atol=5e-2, rtol=5e-2), \
        f"mismatch vs reference, max |err|={max_err}"

    print("KERNEL_OK")
</pallas_src>

<mosaic_0001>
module attributes {stable_mosaic.version = 11 : i64} {
  func.func @_norm_qkv_kernel(%arg0: i32, %arg1: i32, %arg2: memref<1x8x32xf32, #tpu.memory_space<vmem>>, %arg3: memref<1xf32, #tpu.memory_space<smem>>, %arg4: memref<32x32xbf16, #tpu.memory_space<vmem>>, %arg5: memref<32x16xbf16, #tpu.memory_space<vmem>>, %arg6: memref<1x32xf32, #tpu.memory_space<vmem>>, %arg7: memref<1x16xf32, #tpu.memory_space<vmem>>, %arg8: memref<1x8x32xbf16, #tpu.memory_space<vmem>>, %arg9: memref<1x8x16xbf16, #tpu.memory_space<vmem>>) attributes {dimension_semantics = [#tpu.dimension_semantics<parallel>, #tpu.dimension_semantics<parallel>], iteration_bounds = array<i64: 2, 1>, scalar_prefetch = 0 : i64, scratch_operands = 0 : i64, tpu.core_type = #tpu.core_type<tc>, window_params = [{transform_indices = @transform_0, window_bounds = array<i64: 1, 8, 32>}, {transform_indices = @transform_1, window_bounds = array<i64: 1>}, {pipeline_mode = #tpu.pipeline_mode<synchronous>, transform_indices = @transform_2, window_bounds = array<i64: 32, 32>}, {pipeline_mode = #tpu.pipeline_mode<synchronous>, transform_indices = @transform_3, window_bounds = array<i64: 32, 16>}, {pipeline_mode = #tpu.pipeline_mode<synchronous>, transform_indices = @transform_4, window_bounds = array<i64: 1, 32>}, {pipeline_mode = #tpu.pipeline_mode<synchronous>, transform_indices = @transform_5, window_bounds = array<i64: 1, 16>}, {transform_indices = @transform_6, window_bounds = array<i64: 1, 8, 32>}, {transform_indices = @transform_7, window_bounds = array<i64: 1, 8, 16>}]} {
    %c0 = arith.constant 0 : index
    %c0_0 = arith.constant 0 : index
    %c0_1 = arith.constant 0 : index
    %0 = vector.load %arg2[%c0, %c0_0, %c0_1] : memref<1x8x32xf32, #tpu.memory_space<vmem>>, vector<1x8x32xf32>
    %1 = vector.shape_cast %0 : vector<1x8x32xf32> to vector<8x32xf32>
    %2 = arith.mulf %1, %1 : vector<8x32xf32>
    %cst = arith.constant dense<0.000000e+00> : vector<8xf32>
    %3 = vector.multi_reduction <add>, %2, %cst [1] : vector<8x32xf32> to vector<8xf32>
    %4 = vector.shape_cast %3 : vector<8xf32> to vector<8x1xf32>
    %cst_2 = arith.constant 1.000000e-10 : f32
    %5 = vector.broadcast %cst_2 : f32 to vector<8x1xf32>
    %6 = arith.maximumf %4, %5 : vector<8x1xf32>
    %7 = math.rsqrt %6 : vector<8x1xf32>
    %c0_3 = arith.constant 0 : index
    %8 = memref.load %arg3[%c0_3] : memref<1xf32, #tpu.memory_space<smem>>
    %9 = vector.broadcast %8 : f32 to vector<8x1xf32>
    %10 = arith.mulf %9, %7 : vector<8x1xf32>
    %11 = vector.broadcast %10 : vector<8x1xf32> to vector<8x32xf32>
    %12 = arith.mulf %11, %1 : vector<8x32xf32>
    %13 = arith.truncf %12 : vector<8x32xf32> to vector<8x32xbf16>
    %c0_4 = arith.constant 0 : index
    %c0_5 = arith.constant 0 : index
    %14 = vector.load %arg4[%c0_4, %c0_5] : memref<32x32xbf16, #tpu.memory_space<vmem>>, vector<32x32xbf16>
    %cst_6 = arith.constant dense<0.000000e+00> : vector<8x32xf32>
    %15 = tpu.matmul %13, %14, %cst_6 {dimension_numbers = #tpu.dot_dimension_numbers<[1], [0], [0], [1], [0, 0, 1, 1], [], []>} : vector<8x32xbf16>, vector<32x32xbf16>, vector<8x32xf32> -> vector<8x32xf32>
    %c0_7 = arith.constant 0 : index
    %c0_8 = arith.constant 0 : index
    %16 = vector.load %arg6[%c0_7, %c0_8] : memref<1x32xf32, #tpu.memory_space<vmem>>, vector<1x32xf32>
    %17 = vector.broadcast %16 : vector<1x32xf32> to vector<8x32xf32>
    %18 = arith.addf %15, %17 : vector<8x32xf32>
    %19 = arith.truncf %18 : vector<8x32xf32> to vector<8x32xbf16>
    %c0_9 = arith.constant 0 : index
    %c0_10 = arith.constant 0 : index
    %c0_11 = arith.constant 0 : index
    %20 = vector.load %arg8[%c0_9, %c0_10, %c0_11] : memref<1x8x32xbf16, #tpu.memory_space<vmem>>, vector<1x8x32xbf16>
    %21 = vector.shape_cast %20 : vector<1x8x32xbf16> to vector<8x32xbf16>
    %22 = vector.shape_cast %19 : vector<8x32xbf16> to vector<1x8x32xbf16>
    tpu.vector_store %arg8[%c0_9, %c0_10, %c0_11], %22 {strides = array<i32>} : memref<1x8x32xbf16, #tpu.memory_space<vmem>>, vector<1x8x32xbf16>,
    %c0_12 = arith.constant 0 : index
    %c0_13 = arith.constant 0 : index
    %23 = vector.load %arg5[%c0_12, %c0_13] : memref<32x16xbf16, #tpu.memory_space<vmem>>, vector<32x16xbf16>
    %cst_14 = arith.constant dense<0.000000e+00> : vector<8x16xf32>
    %24 = tpu.matmul %13, %23, %cst_14 {dimension_numbers = #tpu.dot_dimension_numbers<[1], [0], [0], [1], [0, 0, 1, 1], [], []>} : vector<8x32xbf16>, vector<32x16xbf16>, vector<8x16xf32> -> vector<8x16xf32>
    %c0_15 = arith.constant 0 : index
    %c0_16 = arith.constant 0 : index
    %25 = vector.load %arg7[%c0_15, %c0_16] : memref<1x16xf32, #tpu.memory_space<vmem>>, vector<1x16xf32>
    %26 = vector.broadcast %25 : vector<1x16xf32> to vector<8x16xf32>
    %27 = arith.addf %24, %26 : vector<8x16xf32>
    %28 = arith.truncf %27 : vector<8x16xf32> to vector<8x16xbf16>
    %c0_17 = arith.constant 0 : index
    %c0_18 = arith.constant 0 : index
    %c0_19 = arith.constant 0 : index
    %29 = vector.load %arg9[%c0_17, %c0_18, %c0_19] : memref<1x8x16xbf16, #tpu.memory_space<vmem>>, vector<1x8x16xbf16>
    %30 = vector.shape_cast %29 : vector<1x8x16xbf16> to vector<8x16xbf16>
    %31 = vector.shape_cast %28 : vector<8x16xbf16> to vector<1x8x16xbf16>
    tpu.vector_store %arg9[%c0_17, %c0_18, %c0_19], %31 {strides = array<i32>} : memref<1x8x16xbf16, #tpu.memory_space<vmem>>, vector<1x8x16xbf16>,
    return
  }
  func.func @transform_0(%arg0: i32, %arg1: i32) -> (i32, i32, i32) {
    %c0_i32 = arith.constant 0 : i32
    %c0_i32_0 = arith.constant 0 : i32
    return %arg0, %arg1, %c0_i32 : i32, i32, i32
  }
  func.func @transform_1(%arg0: i32, %arg1: i32) -> i32 {
    %c0_i32 = arith.constant 0 : i32
    %c0_i32_0 = arith.constant 0 : i32
    return %c0_i32 : i32
  }
  func.func @transform_2(%arg0: i32, %arg1: i32) -> (i32, i32) {
    %c0_i32 = arith.constant 0 : i32
    %c0_i32_0 = arith.constant 0 : i32
    %c0_i32_1 = arith.constant 0 : i32
    return %c0_i32, %c0_i32_0 : i32, i32
  }
  func.func @transform_3(%arg0: i32, %arg1: i32) -> (i32, i32) {
    %c0_i32 = arith.constant 0 : i32
    %c0_i32_0 = arith.constant 0 : i32
    %c0_i32_1 = arith.constant 0 : i32
    return %c0_i32, %c0_i32_0 : i32, i32
  }
  func.func @transform_4(%arg0: i32, %arg1: i32) -> (i32, i32) {
    %c0_i32 = arith.constant 0 : i32
    %c0_i32_0 = arith.constant 0 : i32
    %c0_i32_1 = arith.constant 0 : i32
    return %c0_i32, %c0_i32_0 : i32, i32
  }
  func.func @transform_5(%arg0: i32, %arg1: i32) -> (i32, i32) {
    %c0_i32 = arith.constant 0 : i32
    %c0_i32_0 = arith.constant 0 : i32
    %c0_i32_1 = arith.constant 0 : i32
    return %c0_i32, %c0_i32_0 : i32, i32
  }
  func.func @transform_6(%arg0: i32, %arg1: i32) -> (i32, i32, i32) {
    %c0_i32 = arith.constant 0 : i32
    %c0_i32_0 = arith.constant 0 : i32
    return %arg0, %arg1, %c0_i32 : i32, i32, i32
  }
  func.func @transform_7(%arg0: i32, %arg1: i32) -> (i32, i32, i32) {
    %c0_i32 = arith.constant 0 : i32
    %c0_i32_0 = arith.constant 0 : i32
    return %arg0, %arg1, %c0_i32 : i32, i32, i32
  }
}

</mosaic_0001>

<bundles_post_ra>
// kernel: tpu_custom_call.1
= control target key start
LH: loop header
LB: loop body
LE: loop exit
PB: predicated region body
PF: predicated region fallthrough
CT: control target
= control target key end

     0   :  { %s1146_s0 = inlined_call_operand.vmem [shape: f32[2,8,32], index: 0, kind: input, shape index: {}]   ;;  %s1147_s1 = inlined_call_operand.<no memory space> [shape: f32[1], index: 1, kind: input, shape index: {}]   ;;  %s1148_s2 = inlined_call_operand.hbm [shape: bf16[32,32], index: 2, kind: input, shape index: {}]   ;;  %s1149_s3 = inlined_call_operand.vmem [shape: bf16[32,16], index: 3, kind: input, shape index: {}]   ;;  %s1150_s4 = inlined_call_operand.vmem [shape: f32[1,32], index: 4, kind: input, shape index: {}]   ;;  %s1151_s5 = inlined_call_operand.vmem [shape: f32[1,16], index: 5, kind: input, shape index: {}]   ;;  %s1152_s6 = inlined_call_operand.hbm [shape: bf16[2,8,32], index: 6, kind: output, shape index: {0}]   ;;  %s1153_s7 = inlined_call_operand.hbm [shape: bf16[2,8,16], index: 7, kind: output, shape index: {1}]  }
   0x1   :  { %13 = sst [smem:[#allocation2]] %s1147_s1 }
   0x2   :  { %14 = vsyncpa [#allocation4], 0 }
   0x3   :  { %15 = vsyncpa [#allocation5], 0 }
   0x4   :  { %17 = vsyncpa [#allocation5 + $0x1], 0 }
   0x5   :  { %18 = vsyncpa [#allocation8], 0 }
   0x6   :  { %20 = vsyncpa [#allocation8 + $0x1], 0  ;;  %s948_s26 = smov 0   ;;  %s950_s27 = smov 0  }
   0x7   :  { %s952_s28 = smov 0   ;;  %s954_s29 = smov 0  }
   0x8   :  { %s956_s30 = smov 0   ;;  %s958_s8 = smov 0  }
   0x9 LB: > { %s627_s1 = sadd.s32 4294967295, %s896_s8   ;;  %s628_s9 = sadd.s32 4294967294, %s896_s8   ;;  %s896_s8 = sphi %s958_s8, %s26_s8   ;;  %s892_s30 = sphi %s956_s30, %s1171_s30   ;;  %s888_s29 = sphi %s954_s29, %s1170_s29   ;;  %s884_s28 = sphi %s952_s28, %s1169_s28   ;;  %s880_s27 = sphi %s950_s27, %s1168_s27   ;;  %s876_s26 = sphi %s948_s26, %s1167_s26  }
   0xa   : > { %s38_s10 = sadd.s32 1, %s892_s30  ;;  %s180_s11 = sadd.s32 1, %s884_s28 }
   0xb   : > { %p40_p0 = scmp.ge.s32.totalorder %s38_s10, 2  ;;  %p190_p1 = scmp.ne.s32.totalorder %s884_s28, %s880_s27 }
   0xc   : > { %p191_p2 = scmp.eq.s32.totalorder %s627_s1, 1  ;;  %p196_p3 = scmp.ne.s32.totalorder %s880_s27, %s876_s26 }
   0xd   : > { %s1173_s10 = smov (%p40_p0, %s38_s10), 0  ;;  %p197_p5 = scmp.eq.s32.totalorder %s628_s9, 1 }
   0xe   : > { %p988_p4 = por %p191_p2, %p190_p1  ;;  %s175_s13 = ssub.s32 %s892_s30, %s1173_s10 }
   0xf   : > { %p629_p6 = scmp.ge.s32.totalorder %s896_s8, 1  ;;  %p178_p7 = scmp.eq.s32.totalorder %s175_s13, 0 }
  0x10   : > { %s1158_s12 = scalar_select %p988_p4, 1, 0 }
  0x11   : > { %p995_p8 = por %p197_p5, %p196_p3  ;;  %p232_p9 = scmp.lt.s32.totalorder %s896_s8, 3 }
  0x12   : > { %s1001_s15 = scalar_select %p178_p7, %s884_s28, %s180_s11  }
  0x13   : > { %s1159_s14 = scalar_select %p995_p8, 1, 0 }
  0x14   : > { %p1003_p10 = pnand %p629_p6, %p232_p9  ;;  %p1007_p11 = scmp.eq.s32.totalorder %s627_s1, 0 }
  0x15   : > { %s898_s18 = smov [#allocation3]   ;;  %s754_s23 = scalar_lea.hbm %s1148_s2, 256 }
  0x16   : > { %s1160_s16 = scalar_select %p1003_p10, 1, 0 }
  0x17   : > { %s1161_s17 = scalar_select %p1007_p11, 1, 0 }
  0x18   : > { %p681_p12 = pneg %p1003_p10  ;;  %s247_s19 = sshll.u32 %s898_s18, 4  ;;  %s248_s19 = int_to_ptr.vmem [resolvable:$true] %s247_s19 }
  0x19   : > { %p755_p0 = scmp.ne.s32.totalorder %s1148_s2, %s754_s23  ;;  %p761_p5 = scmp.lt.u32.totalorder %s754_s23, %s1148_s2 }
  0x1a   : > { %p1015_p13 = pnand %p1007_p11, %p681_p12 }
  0x1c   : > { %p756_p1 = pneg %p1015_p13 }
  0x1e   : > { %p757_p2 = pnand %p756_p1, %p755_p0 }
  0x20   : > { %p758_p3 = pneg %p757_p2 }
  0x22   : > { %p763_p6 = pnand %p761_p5, %p758_p3 }
  0x24   : > { %766 = shalt.err (!%p763_p6)
}
  0x25   : > { %s767_s11 = scalar_lea.vmem %s248_s19, 256  ;;  %p775_p8 = scmp.lt.s32.totalorder %s248_s19, %s248_s19 }
  0x26   : > { %p768_p7 = scmp.ne.s32.totalorder %s248_s19, %s767_s11  ;;  %p776_p4 = scmp.lt.s32.totalorder %s767_s11, %s767_s11 }
  0x28   : > { %p770_p9 = pnand %p768_p7, %p756_p1  ;;  %p777_p11 = por %p776_p4, %p775_p8 }
  0x2a   : > { %p771_p12 = pneg %p770_p9 }
  0x2c   : > { %p778_p10 = pnand %p777_p11, %p771_p12 }
  0x2e   : > { %781 = shalt.err (!%p778_p10)
}
  0x2f   : > { %s899_s13 = smov 64   ;;  %s900_s18 = smov 4  }
  0x30   : > { %684 = dma.hbm_to_vmem [thread:$0]  (!%p1015_p13), %s1148_s2, 256, %s248_s19, [#allocation4], %s899_s13, %s899_s13, %s900_s18  }
  0x31   : > { %p1163_p0 = scmp.ne.s32.totalorder %s1160_s16, 0 }
  0x32   : > { %p1164_p2 = scmp.ne.s32.totalorder (!%p1163_p0), %s1161_s17, 0 }
  0x33   : > { %282 = sbr.rel (%p1163_p0) target bundleno = 484 (0x1e4), region = 44 }
  0x3a   : > { %863 = dma.done.wait (%p1164_p2), [#allocation4], 256  }
  0x3b   : > { %865 = vsyncadd (%p1164_p2), [#allocation4], 4294967040  ;;  %p321_p4 = scmp.lt.s32.totalorder %s888_s29, 1  ;;  %vm331_vm0 = vcmask 261120   ;;  %v748_v3 = vld [vmem:[#allocation3] sm:$0xff]   ;;  %v901_v5 = vmov 0.0  }
  0x3c   : > { %v749_v4 = vld [vmem:[%s1149_s3] sm:$0xff]   ;;  %657 = vmatprep.subr.bf16.mxu0 %v901_v5  ;;  %665 = vmatprep.subr.bf16.mxu1 %v901_v5  ;;  %v750_v6 = vld [vmem:[#allocation3 + $0x8] sm:$0xff]   ;;  %vm902_vm1 = vmmov 0   ;;  %s337_s11 = sld [smem:[#allocation2]]  ;;  %s1056_s13 = sand.u32 1, %s880_s27   ;;  %vm409_vm2 = vcmask 257024  }
  0x3d   : > { %s322_s23 = scalar_select %p321_p4, %s888_s29, 1  ;;  %658 = vmatpush3.bf16.msra.mxu0 %v748_v3  ;;  %666 = vmatpush3.bf16.msra.mxu1 %v749_v4  ;;  %v751_v7 = vld [vmem:[%s1149_s3 + $0x8] sm:$0xff]   ;;  %v637_v15 = vld [vmem:[%s1150_s4] ss:$0 sm:$0xff]  ;;  %vm475_vm3 = vcmask 125952  }
  0x3e   : > { %659 = vmatprep.subr.bf16.mxu0 %v901_v5  ;;  %667 = vmatprep.subr.bf16.mxu1 %v901_v5  ;;  %s634_s18 = sshll.u32 %s1056_s13, 2  ;;  %v641_v16 = vld [vmem:[%s1151_s5] ss:$0 sm:$0xff]  ;;  %s647_s25 = sshll.u32 %s888_s29, 6 }
  0x3f   : > { %s636_s24 = sshll.u32 %s322_s23, 3  ;;  %661 = vmatprep.mubr.msk.bf16.mxu0 %vm902_vm1, %v901_v5  ;;  %669 = vmatprep.mubr.msk.bf16.mxu1 %vm902_vm1, %v901_v5  ;;  %s313_s20 = scalar_lea.vmem [#allocation6], %s634_s18 }
  0x40   : > { %s327_s1 = scalar_lea.vmem %s1146_s0, %s636_s24  ;;  %s320_s16 = scalar_lea.vmem [#allocation7], %s634_s18 }
  0x41   : > { %v329_v0 = vld [vmem:[%s327_s1] sm:$0xff]  ;;  %660 = vmatpush3.bf16.msra.mxu0 %v750_v6  ;;  %668 = vmatpush3.bf16.msra.mxu1 %v751_v7  ;;  %s497_s1 = sshll.u32 %s313_s20, 4  ;;  %s511_s19 = sshll.u32 %s320_s16, 4  ;;  %s1071_s1 = int_to_ptr.vmem [resolvable:$true] %s497_s1  ;;  %s1078_s19 = int_to_ptr.vmem [resolvable:$true] %s511_s19 }
  0x42   : > { %v330_v1 = vmul.f32 %v329_v0, %v329_v0  ;;  %v338_v10 = vstv %s337_s11  ;;  %s1069_s11 = scalar_lea.hbm %s1152_s6, %s647_s25  ;;  %s1076_s21 = scalar_lea.hbm %s1153_s7, %s647_s25 }
  0x43   : > { %s478_s22 = scalar_lea.sflag [#allocation5], %s1056_s13  ;;  %s782_s23 = scalar_lea.vmem %s1071_s1, 64 }
  0x44   : > { %v332_v2 = vsel %vm331_vm0, %v330_v1, 0.0  ;;  %p783_p8 = scmp.ne.s32.totalorder %s1071_s1, %s782_s23  ;;  %p1165_p10 = scmp.ne.s32.totalorder %s1158_s12, 0 }
  0x45   : > { %333 = vadd.xlane.f32.xlu0 %v332_v2  ;;  %s903_s24 = smov [#allocation6]  }
  0x46   : > { %p784_p11 = pnand %p783_p8, %p1165_p10  ;;  %s786_s17 = sshll.u32 %s903_s24, 4  ;;  %s787_s17 = int_to_ptr.vmem [resolvable:$false] %s786_s17 }
  0x47   : > { %s788_s9 = scalar_lea.vmem %s787_s17, 128  ;;  %p789_p1 = scmp.lt.s32.totalorder %s1071_s1, %s787_s17 }
  0x48   : > { %p785_p13 = pneg %p784_p11  ;;  %p790_p3 = scmp.lt.s32.totalorder %s788_s9, %s782_s23 }
  0x4a   : > { %p791_p5 = por %p790_p3, %p789_p1 }
  0x4c   : > { %p792_p6 = pnand %p791_p5, %p785_p13 }
  0xd2   : > { %v334_v8 = vpop.xlane.xlu0 %333 }
  0xd3   : > { %v335_v9 = vmax.f32 %v334_v8, 1e-10 }
  0xd5   : > { %752 = vrsqrt.f32 %v335_v9 }
  0xdf   : > { %v753_v11 = vpop.eup %752 }
  0xe0   : > { %v339_v12 = vmul.f32 %v753_v11, %v338_v10 }
  0xe2   : > { %v340_v13 = vmul.f32 %v339_v12, %v329_v0 }
  0xe4   : > { %v341_v14 = vpack.c.bf16 %v340_v13, %v340_v13 }
  0xe6   : > { %662 = vmatmul.mubr.msk.bf16.vlgmr.msra.gmra.mrb[0].mxu0 %vm331_vm0, %v341_v14  ;;  %670 = vmatmul.mubr.msk.bf16.vlgmr.msra.gmra.mrb[0].mxu1 %vm331_vm0, %v341_v14 }
 0x1b9   : > { %v402_v17 = vpop.f32.mrb[0].mxu0  ;;  %v468_v18 = vpop.f32.mrb[0].mxu1 }
 0x1ba   : > { %v403_v19 = vadd.f32 %v637_v15, %v402_v17  ;;  %v469_v20 = vadd.f32 %v641_v16, %v468_v18  ;;  %v663_v21 = vpop.f32.mrb[1].mxu0  ;;  %v671_v22 = vpop.f32.mrb[1].mxu1 }
 0x1bb   : > { %v405_v23 = vpop.f32.mrb[2].mxu0  ;;  %v471_v24 = vpop.f32.mrb[2].mxu1 }
 0x1bc   : > { %v408_v25 = vpack.c.bf16 %v403_v19, %v403_v19  ;;  %v474_v26 = vpack.c.bf16 %v469_v20, %v469_v20  ;;  %v664_v27 = vpop.f32.mrb[3].mxu0  ;;  %v672_v28 = vpop.f32.mrb[3].mxu1 }
 0x1be   : > { %410 = vst.msk [vmem:[%s313_s20] sm:$0xf] %vm409_vm2, %v408_v25 }
 0x1bf   : > { %476 = vst.msk [vmem:[%s320_s16] sm:$0xf] %vm475_vm3, %v474_v26 }
 0x1c0   : > { %795 = shalt.err (!%p792_p6)
}
 0x1c1   : > { %s796_s25 = scalar_lea.hbm %s1069_s11, 64  ;;  %s800_s29 = scalar_lea.hbm %s1152_s6, 128 }
 0x1c2   : > { %p797_p7 = scmp.ne.s32.totalorder %s1069_s11, %s796_s25  ;;  %p801_p0 = scmp.lt.u32.totalorder %s1069_s11, %s1152_s6 }
 0x1c3   : > { %p802_p2 = scmp.lt.u32.totalorder %s800_s29, %s796_s25  ;;  %p804_p8 = scmp.lt.u32.totalorder %s796_s25, %s1069_s11 }
 0x1c4   : > { %p798_p9 = pnand %p797_p7, %p1165_p10 }
 0x1c5   : > { %p803_p4 = por %p802_p2, %p801_p0 }
 0x1c6   : > { %p799_p12 = pneg %p798_p9 }
 0x1c7   : > { %p805_p11 = por %p804_p8, %p803_p4 }
 0x1c9   : > { %p806_p13 = pnand %p805_p11, %p799_p12 }
 0x1cb   : > { %809 = shalt.err (!%p806_p13)
}
 0x1cc   : > { %677 = dma.vmem_to_hbm [thread:$0]  (%p1165_p10), %s1071_s1, 64, %s1069_s11, %s478_s22  }
 0x1cd   : > { %s483_s23 = scalar_lea.sflag [#allocation8], %s1056_s13  ;;  %s810_s17 = scalar_lea.vmem %s1078_s19, 64 }
 0x1ce   : > { %p811_p1 = scmp.ne.s32.totalorder %s1078_s19, %s810_s17  ;;  %s904_s9 = smov [#allocation7]  }
 0x1cf   : > { %s814_s25 = sshll.u32 %s904_s9, 4  ;;  %s815_s25 = int_to_ptr.vmem [resolvable:$false] %s814_s25 }
 0x1d0   : > { %p812_p3 = pnand %p811_p1, %p1165_p10  ;;  %s816_s20 = scalar_lea.vmem %s815_s25, 128 }
 0x1d1   : > { %p817_p6 = scmp.lt.s32.totalorder %s1078_s19, %s815_s25  ;;  %p818_p7 = scmp.lt.s32.totalorder %s816_s20, %s810_s17 }
 0x1d2   : > { %p813_p5 = pneg %p812_p3 }
 0x1d3   : > { %p819_p9 = por %p818_p7, %p817_p6 }
 0x1d5   : > { %p820_p12 = pnand %p819_p9, %p813_p5 }
 0x1d7   : > { %823 = shalt.err (!%p820_p12)
}
 0x1d8   : > { %s824_s13 = scalar_lea.hbm %s1076_s21, 64  ;;  %s828_s22 = scalar_lea.hbm %s1153_s7, 128 }
 0x1d9   : > { %p825_p0 = scmp.ne.s32.totalorder %s1076_s21, %s824_s13  ;;  %p829_p8 = scmp.lt.u32.totalorder %s1076_s21, %s1153_s7 }
 0x1da   : > { %p830_p11 = scmp.lt.u32.totalorder %s828_s22, %s824_s13  ;;  %p832_p1 = scmp.lt.u32.totalorder %s824_s13, %s1076_s21 }
 0x1db   : > { %p826_p2 = pnand %p825_p0, %p1165_p10 }
 0x1dc   : > { %p831_p13 = por %p830_p11, %p829_p8 }
 0x1dd   : > { %p827_p4 = pneg %p826_p2 }
 0x1de   : > { %p833_p3 = por %p832_p1, %p831_p13 }
 0x1e0   : > { %p834_p5 = pnand %p833_p3, %p827_p4 }
 0x1e2   : > { %837 = shalt.err (!%p834_p5)
}
 0x1e3   : > { %678 = dma.vmem_to_hbm [thread:$0]  (%p1165_p10), %s1078_s19, 64, %s1076_s21, %s483_s23  }
 0x1e4 PF: > { %p694_p6 = scmp.ge.s32.totalorder %s896_s8, 2  ;;  %s523_s18 = sand.u32 1, %s876_s26  }
 0x1e5   : > { %p1166_p7 = scmp.ne.s32.totalorder %s1159_s14, 0  ;;  %s524_s24 = scalar_lea.sflag [#allocation5], %s523_s18 }
 0x1e7   : > { %p686_p9 = pnand %p694_p6, %p1166_p7 }
 0x1e9   : > { %867 = dma.done.wait (!%p686_p9), %s524_s24, 64  }
 0x1ea   : > { %869 = vsyncadd (!%p686_p9), %s524_s24, 4294967232  ;;  %s533_s17 = scalar_lea.sflag [#allocation8], %s523_s18 }
 0x1eb   : > { %871 = dma.done.wait (!%p686_p9), %s533_s17, 64  }
 0x1ec   : > { %873 = vsyncadd (!%p686_p9), %s533_s17, 4294967232  ;;  %s26_s8 = sadd.s32 1, %s896_s8   ;;  %s1167_s26 = smov %s880_s27 }
 0x1ed   : > { %p23_p12 = scmp.ge.s32.totalorder %s26_s8, 4   ;;  %s1168_s27 = smov %s884_s28 }
 0x1ee   : > { %s1169_s28 = smov %s1001_s15  ;;  %s1170_s29 = smov %s892_s30 }
 0x1ef   : > { %s1171_s30 = smov %s1173_s10  ;;  %25 = sbr.rel (!%p23_p12) target bundleno = 9 (0x9), region = 101 }
 0x1f6   :  { %538 = vsyncpa [#allocation4], 1 }
 0x1f7   :  { %540 = vsyncpa [#allocation4 + $0x1], 1 }
 0x1f8   :  { %541 = vsyncpa [#allocation5], 1 }
 0x1f9   :  { %543 = vsyncpa [#allocation5 + $0x1], 1 }
 0x1fa   :  { %544 = vsyncpa [#allocation8], 1 }
 0x1fb   :  { %546 = vsyncpa [#allocation8 + $0x1], 1 }

</bundles_post_ra>
